<compile_context>
chip_gen: v5e
topology: v5e:2x2
jax: 0.10.0
libtpu: 0.0.40
codegen_flags: <defaults>
</compile_context>

<pallas_src>
import functools

import jax
import jax.numpy as jnp
from jax.experimental import pallas as pl
from jax.experimental.pallas import tpu as pltpu


# Explicit scoped-VMEM limit: safe on every generation (v5e/v6e have 128 MiB
# physical, v7x has 64 MiB physical / 32 MiB default scoped).
_VMEM_LIMIT_BYTES = 32 * 1024 * 1024


def attention_kernel(k_ref, q_ref, v_ref, wk_ref, wq_ref, bkq_ref, wv_ref,
                     o_ref, *, seq_len, bt):
    # K projection: fold the (S, bt) leading dims into one big-M MXU matmul.
    # bt is always a multiple of 8 (wrapper pads the batch), so this reshape is
    # a layout-preserving metadata change, not a relayout.
    k2d = k_ref[...].reshape(seq_len * bt, -1)                       # (S*bt, H)
    kp = jnp.dot(k2d, wk_ref[...],
                 preferred_element_type=jnp.float32)                 # (S*bt, A)
    # Q projection once per grid step for the whole batch tile.
    qp = jnp.dot(q_ref[...], wq_ref[...],
                 preferred_element_type=jnp.float32)                 # (bt, A)

    # Additive scores in the native seq-major layout.  (Key bias and query bias
    # are fused into a single bkq row by the wrapper.)
    a = kp.reshape(seq_len, bt, -1) + qp[None, :, :] + bkq_ref[...]  # (S, bt, A)
    score = jnp.tanh(a)                                              # EUP

    # Wv has a single output column -> VPU multiply + lane reduce, no N=1 matmul.
    alpha = jnp.sum(score * wv_ref[...], axis=-1, keepdims=True)     # (S, bt, 1)

    # Softmax over the sequence axis (leading axis -> cross-vreg VPU max/add,
    # no XLU).  bv is omitted: a constant added before softmax cancels exactly.
    m = jnp.max(alpha, axis=0, keepdims=True)                        # (1, bt, 1)
    e = jnp.exp(alpha - m)                                           # (S, bt, 1)
    w = e / jnp.sum(e, axis=0, keepdims=True)                        # exact divide

    # alpha^T @ V per batch element is an M=1 matmul -> VPU multiply + cross-vreg
    # sum over S instead.  Writeback block spans the full H dim -> contiguous DMA.
    v = v_ref[...].astype(jnp.float32)                               # (S, bt, H)
    o_ref[...] = jnp.sum(w * v, axis=0).astype(o_ref.dtype)          # (bt, H)


def _pick_batch_tile(bp, s, h, a, itemsize):
    """Largest batch tile fitting the VMEM budget, preferring >=2 (even) grid steps."""
    budget = _VMEM_LIMIT_BYTES // 2
    def footprint(bt):
        kv = 4 * bt * s * h * itemsize     # K + V tiles, double-buffered
        tmp = 4 * bt * s * a * 4           # live f32 temporaries (kp/score/e/w)
        qo = 4 * bt * h * itemsize         # Q input + output block, double-buffered
        return kv + tmp + qo
    candidates = [bt for bt in range(8, bp + 1, 8) if bp % bt == 0]
    fitting = [bt for bt in candidates if footprint(bt) <= budget]
    if not fitting:                        # nothing fits: take the smallest legal tile
        return candidates[0]
    def goodness(bt):
        nb = bp // bt
        return (nb >= 2,          # DMA/compute overlap; megacore has work to shard
                nb % 2 == 0,      # balanced across the 2 TensorCores of a v7x chip
                bt * s >= 512,    # amortize ~0.35 us/step grid overhead
                bt)               # then: biggest MXU M dimension
    return max(fitting, key=goodness)


def additive_attention(key, value, query, params, *, batch_tile=None):
    """key, value: (S, B, H); query: (1, B, H)  -> (B, 1, H) float32."""
    S, B, H = key.shape
    A = params["Wk"].shape[1]

    # Pad the batch to a multiple of 8 so batch tiles are sublane-aligned.
    # Real workloads normally have B % 8 == 0 and this is a no-op; for tiny /
    # odd batches the pad cost is negligible.
    Bp = -(-B // 8) * 8
    if Bp != B:
        pad = [(0, 0), (0, Bp - B), (0, 0)]
        key = jnp.pad(key, pad)
        value = jnp.pad(value, pad)
        query = jnp.pad(query, pad)

    if batch_tile is None:
        batch_tile = _pick_batch_tile(Bp, S, H, A, key.dtype.itemsize)
    assert Bp % batch_tile == 0 and batch_tile % 8 == 0, "batch_tile must be a multiple of 8 dividing the padded batch"
    nb = Bp // batch_tile

    query2d = query.reshape(Bp, H)                                   # (1, Bp, H) -> (Bp, H): free
    bkq = (params["bk"] + params["bq"]).astype(jnp.float32)          # fused bias (1, A)
    wv_row = params["Wv"].T.astype(jnp.float32)                      # (1, A)
    # bv is mathematically a no-op under softmax -> not passed at all.

    kernel = functools.partial(attention_kernel, seq_len=S, bt=batch_tile)
    out2d = pl.pallas_call(
        kernel,
        out_shape=jax.ShapeDtypeStruct((Bp, H), jnp.float32),
        grid_spec=pltpu.PrefetchScalarGridSpec(
            num_scalar_prefetch=0,
            grid=(nb,),
            in_specs=[
                pl.BlockSpec((S, batch_tile, H), lambda i: (0, i, 0)),  # key, native layout
                pl.BlockSpec((batch_tile, H), lambda i: (i, 0)),        # query
                pl.BlockSpec((S, batch_tile, H), lambda i: (0, i, 0)),  # value, native layout
                pl.BlockSpec((H, A), lambda i: (0, 0)),                 # Wk
                pl.BlockSpec((H, A), lambda i: (0, 0)),                 # Wq
                pl.BlockSpec((1, A), lambda i: (0, 0)),                 # bk + bq (fused)
                pl.BlockSpec((1, A), lambda i: (0, 0)),                 # Wv as a row
            ],
            out_specs=pl.BlockSpec((batch_tile, H), lambda i: (i, 0)),
        ),
        compiler_params=pltpu.CompilerParams(
            dimension_semantics=("parallel",),
            vmem_limit_bytes=_VMEM_LIMIT_BYTES),
    )(key, query2d, value, params["Wk"], params["Wq"], bkq, wv_row)

    return out2d[:B, None, :]                                        # (B, 1, H)


def attention_ref(key, value, query, p):
    """Pure-JAX reference reproducing the PyTorch forward exactly (incl. bv)."""
    hi = jax.lax.Precision.HIGHEST
    K = jnp.einsum('sbh,ha->sba', key, p["Wk"], precision=hi) + p["bk"][0]
    Q = jnp.einsum('qbh,ha->qba', query, p["Wq"], precision=hi) + p["bq"][0]
    score = jnp.tanh(K + Q)
    alpha = jnp.einsum('sba,ao->sbo', score, p["Wv"], precision=hi) + p["bv"][0]
    alpha = jnp.transpose(alpha, (1, 2, 0))                          # (B, 1, S)
    alpha = jax.nn.softmax(alpha, axis=2)
    V = jnp.transpose(value, (1, 0, 2))                              # (B, S, H)
    return jnp.einsum('bos,bsh->boh', alpha, V, precision=hi)        # (B, 1, H)


if __name__ == "__main__":
    S, B, H, A = 8, 2, 32, 16   # seq_len, batch, hidden_size, attention_hidden

    rng = jax.random.PRNGKey(0)
    ks = jax.random.split(rng, 9)

    # Deterministic params (Linear weights stored as (in, out) for x @ W + b).
    params = {
        "Wk": 0.1 * jax.random.normal(ks[3], (H, A), dtype=jnp.float32),
        "bk": 0.1 * jax.random.normal(ks[4], (1, A), dtype=jnp.float32),
        "Wq": 0.1 * jax.random.normal(ks[5], (H, A), dtype=jnp.float32),
        "bq": 0.1 * jax.random.normal(ks[6], (1, A), dtype=jnp.float32),
        "Wv": 0.1 * jax.random.normal(ks[7], (A, 1), dtype=jnp.float32),
        "bv": 0.1 * jax.random.normal(ks[8], (1, 1), dtype=jnp.float32),
    }

    # Case 1: the module's nominal small shapes (batch padded 2 -> 8 internally,
    # single grid step).
    key_t = jax.random.normal(ks[0], (S, B, H), dtype=jnp.float32)
    value_t = jax.random.normal(ks[1], (S, B, H), dtype=jnp.float32)
    query_t = jax.random.normal(ks[2], (1, B, H), dtype=jnp.float32)

    out = additive_attention(key_t, value_t, query_t, params)
    jax.block_until_ready(out)
    ref = attention_ref(key_t, value_t, query_t, params)
    assert out.shape == (B, 1, H), out.shape
    # Exact softmax division restores a tight tolerance; the residual is only
    # the MXU's multi-pass f32 matmul vs. the HIGHEST-precision XLA reference.
    assert jnp.allclose(out, ref, atol=1e-4, rtol=1e-4), "case-1 mismatch vs reference"

    # Case 2: exercise the multi-step, batch-tiled "parallel" path (bt=8, 2 steps).
    B2 = 16
    key2 = jax.random.normal(ks[0], (S, B2, H), dtype=jnp.float32)
    value2 = jax.random.normal(ks[1], (S, B2, H), dtype=jnp.float32)
    query2 = jax.random.normal(ks[2], (1, B2, H), dtype=jnp.float32)
    out2 = additive_attention(key2, value2, query2, params)
    jax.block_until_ready(out2)
    ref2 = attention_ref(key2, value2, query2, params)
    assert out2.shape == (B2, 1, H), out2.shape
    assert jnp.allclose(out2, ref2, atol=1e-4, rtol=1e-4), "case-2 mismatch vs reference"

    print("KERNEL_OK")
</pallas_src>

<mosaic_0001>
module attributes {stable_mosaic.version = 11 : i64} {
  func.func @attention_kernel(%arg0: i32, %arg1: memref<8x8x32xf32, #tpu.memory_space<vmem>>, %arg2: memref<8x32xf32, #tpu.memory_space<vmem>>, %arg3: memref<8x8x32xf32, #tpu.memory_space<vmem>>, %arg4: memref<32x16xf32, #tpu.memory_space<vmem>>, %arg5: memref<32x16xf32, #tpu.memory_space<vmem>>, %arg6: memref<1x16xf32, #tpu.memory_space<vmem>>, %arg7: memref<1x16xf32, #tpu.memory_space<vmem>>, %arg8: memref<8x32xf32, #tpu.memory_space<vmem>>) attributes {dimension_semantics = [#tpu.dimension_semantics<parallel>], iteration_bounds = array<i64: 1>, scalar_prefetch = 0 : i64, scratch_operands = 0 : i64, tpu.core_type = #tpu.core_type<tc>, window_params = [{transform_indices = @transform_0, window_bounds = array<i64: 8, 8, 32>}, {transform_indices = @transform_1, window_bounds = array<i64: 8, 32>}, {transform_indices = @transform_2, window_bounds = array<i64: 8, 8, 32>}, {pipeline_mode = #tpu.pipeline_mode<synchronous>, transform_indices = @transform_3, window_bounds = array<i64: 32, 16>}, {pipeline_mode = #tpu.pipeline_mode<synchronous>, transform_indices = @transform_4, window_bounds = array<i64: 32, 16>}, {pipeline_mode = #tpu.pipeline_mode<synchronous>, transform_indices = @transform_5, window_bounds = array<i64: 1, 16>}, {pipeline_mode = #tpu.pipeline_mode<synchronous>, transform_indices = @transform_6, window_bounds = array<i64: 1, 16>}, {transform_indices = @transform_7, window_bounds = array<i64: 8, 32>}]} {
    %c0 = arith.constant 0 : index
    %c0_0 = arith.constant 0 : index
    %c0_1 = arith.constant 0 : index
    %0 = vector.load %arg1[%c0, %c0_0, %c0_1] : memref<8x8x32xf32, #tpu.memory_space<vmem>>, vector<8x8x32xf32>
    %1 = vector.shape_cast %0 : vector<8x8x32xf32> to vector<64x32xf32>
    %c0_2 = arith.constant 0 : index
    %c0_3 = arith.constant 0 : index
    %2 = vector.load %arg4[%c0_2, %c0_3] : memref<32x16xf32, #tpu.memory_space<vmem>>, vector<32x16xf32>
    %cst = arith.constant dense<0.000000e+00> : vector<64x16xf32>
    %3 = tpu.matmul %1, %2, %cst {dimension_numbers = #tpu.dot_dimension_numbers<[1], [0], [0], [1], [0, 0, 1, 1], [], []>} : vector<64x32xf32>, vector<32x16xf32>, vector<64x16xf32> -> vector<64x16xf32>
    %c0_4 = arith.constant 0 : index
    %c0_5 = arith.constant 0 : index
    %4 = vector.load %arg2[%c0_4, %c0_5] : memref<8x32xf32, #tpu.memory_space<vmem>>, vector<8x32xf32>
    %c0_6 = arith.constant 0 : index
    %c0_7 = arith.constant 0 : index
    %5 = vector.load %arg5[%c0_6, %c0_7] : memref<32x16xf32, #tpu.memory_space<vmem>>, vector<32x16xf32>
    %cst_8 = arith.constant dense<0.000000e+00> : vector<8x16xf32>
    %6 = tpu.matmul %4, %5, %cst_8 {dimension_numbers = #tpu.dot_dimension_numbers<[1], [0], [0], [1], [0, 0, 1, 1], [], []>} : vector<8x32xf32>, vector<32x16xf32>, vector<8x16xf32> -> vector<8x16xf32>
    %7 = vector.shape_cast %3 : vector<64x16xf32> to vector<8x8x16xf32>
    %8 = vector.shape_cast %6 : vector<8x16xf32> to vector<1x8x16xf32>
    %9 = vector.broadcast %8 : vector<1x8x16xf32> to vector<8x8x16xf32>
    %10 = arith.addf %7, %9 : vector<8x8x16xf32>
    %c0_9 = arith.constant 0 : index
    %c0_10 = arith.constant 0 : index
    %11 = vector.load %arg6[%c0_9, %c0_10] : memref<1x16xf32, #tpu.memory_space<vmem>>, vector<1x16xf32>
    %12 = vector.shape_cast %11 : vector<1x16xf32> to vector<1x1x16xf32>
    %13 = vector.broadcast %12 : vector<1x1x16xf32> to vector<8x8x16xf32>
    %14 = arith.addf %10, %13 : vector<8x8x16xf32>
    %15 = math.tanh %14 : vector<8x8x16xf32>
    %c0_11 = arith.constant 0 : index
    %c0_12 = arith.constant 0 : index
    %16 = vector.load %arg7[%c0_11, %c0_12] : memref<1x16xf32, #tpu.memory_space<vmem>>, vector<1x16xf32>
    %17 = vector.shape_cast %16 : vector<1x16xf32> to vector<1x1x16xf32>
    %18 = vector.broadcast %17 : vector<1x1x16xf32> to vector<8x8x16xf32>
    %19 = arith.mulf %15, %18 : vector<8x8x16xf32>
    %cst_13 = arith.constant dense<0.000000e+00> : vector<8x8xf32>
    %20 = vector.multi_reduction <add>, %19, %cst_13 [2] : vector<8x8x16xf32> to vector<8x8xf32>
    %21 = vector.shape_cast %20 : vector<8x8xf32> to vector<8x8x1xf32>
    %cst_14 = arith.constant dense<0xFF800000> : vector<8x1xf32>
    %22 = vector.multi_reduction <maximumf>, %21, %cst_14 [0] : vector<8x8x1xf32> to vector<8x1xf32>
    %23 = vector.shape_cast %22 : vector<8x1xf32> to vector<1x8x1xf32>
    %24 = vector.broadcast %23 : vector<1x8x1xf32> to vector<8x8x1xf32>
    %25 = arith.subf %21, %24 : vector<8x8x1xf32>
    %26 = math.exp %25 : vector<8x8x1xf32>
    %cst_15 = arith.constant dense<0.000000e+00> : vector<8x1xf32>
    %27 = vector.multi_reduction <add>, %26, %cst_15 [0] : vector<8x8x1xf32> to vector<8x1xf32>
    %28 = vector.shape_cast %27 : vector<8x1xf32> to vector<1x8x1xf32>
    %29 = vector.broadcast %28 : vector<1x8x1xf32> to vector<8x8x1xf32>
    %30 = arith.divf %26, %29 : vector<8x8x1xf32>
    %c0_16 = arith.constant 0 : index
    %c0_17 = arith.constant 0 : index
    %c0_18 = arith.constant 0 : index
    %31 = vector.load %arg3[%c0_16, %c0_17, %c0_18] : memref<8x8x32xf32, #tpu.memory_space<vmem>>, vector<8x8x32xf32>
    %32 = vector.broadcast %30 : vector<8x8x1xf32> to vector<8x8x32xf32>
    %33 = arith.mulf %32, %31 : vector<8x8x32xf32>
    %cst_19 = arith.constant dense<0.000000e+00> : vector<8x32xf32>
    %34 = vector.multi_reduction <add>, %33, %cst_19 [0] : vector<8x8x32xf32> to vector<8x32xf32>
    %c0_20 = arith.constant 0 : index
    %c0_21 = arith.constant 0 : index
    %35 = vector.load %arg8[%c0_20, %c0_21] : memref<8x32xf32, #tpu.memory_space<vmem>>, vector<8x32xf32>
    tpu.vector_store %arg8[%c0_20, %c0_21], %34 {strides = array<i32>} : memref<8x32xf32, #tpu.memory_space<vmem>>, vector<8x32xf32>,
    return
  }
  func.func @transform_0(%arg0: i32) -> (i32, i32, i32) {
    %c0_i32 = arith.constant 0 : i32
    %c0_i32_0 = arith.constant 0 : i32
    %c0_i32_1 = arith.constant 0 : i32
    return %c0_i32, %arg0, %c0_i32_0 : i32, i32, i32
  }
  func.func @transform_1(%arg0: i32) -> (i32, i32) {
    %c0_i32 = arith.constant 0 : i32
    %c0_i32_0 = arith.constant 0 : i32
    return %arg0, %c0_i32 : i32, i32
  }
  func.func @transform_2(%arg0: i32) -> (i32, i32, i32) {
    %c0_i32 = arith.constant 0 : i32
    %c0_i32_0 = arith.constant 0 : i32
    %c0_i32_1 = arith.constant 0 : i32
    return %c0_i32, %arg0, %c0_i32_0 : i32, i32, i32
  }
  func.func @transform_3(%arg0: i32) -> (i32, i32) {
    %c0_i32 = arith.constant 0 : i32
    %c0_i32_0 = arith.constant 0 : i32
    %c0_i32_1 = arith.constant 0 : i32
    return %c0_i32, %c0_i32_0 : i32, i32
  }
  func.func @transform_4(%arg0: i32) -> (i32, i32) {
    %c0_i32 = arith.constant 0 : i32
    %c0_i32_0 = arith.constant 0 : i32
    %c0_i32_1 = arith.constant 0 : i32
    return %c0_i32, %c0_i32_0 : i32, i32
  }
  func.func @transform_5(%arg0: i32) -> (i32, i32) {
    %c0_i32 = arith.constant 0 : i32
    %c0_i32_0 = arith.constant 0 : i32
    %c0_i32_1 = arith.constant 0 : i32
    return %c0_i32, %c0_i32_0 : i32, i32
  }
  func.func @transform_6(%arg0: i32) -> (i32, i32) {
    %c0_i32 = arith.constant 0 : i32
    %c0_i32_0 = arith.constant 0 : i32
    %c0_i32_1 = arith.constant 0 : i32
    return %c0_i32, %c0_i32_0 : i32, i32
  }
  func.func @transform_7(%arg0: i32) -> (i32, i32) {
    %c0_i32 = arith.constant 0 : i32
    %c0_i32_0 = arith.constant 0 : i32
    return %arg0, %c0_i32 : i32, i32
  }
}

</mosaic_0001>

<bundles_post_ra>
// kernel: tpu_custom_call.1
= control target key start
LH: loop header
LB: loop body
LE: loop exit
PB: predicated region body
PF: predicated region fallthrough
CT: control target
= control target key end

     0   :  { %12 = vsyncpa [#allocation3], 0  ;;  %s565_s0 = inlined_call_operand.vmem [shape: f32[8,8,32], index: 0, kind: input, shape index: {}]   ;;  %s566_s1 = inlined_call_operand.vmem [shape: f32[8,32], index: 1, kind: input, shape index: {}]   ;;  %s567_s2 = inlined_call_operand.hbm [shape: f32[8,8,32], index: 2, kind: input, shape index: {}]   ;;  %s568_s3 = inlined_call_operand.vmem [shape: f32[32,16], index: 3, kind: input, shape index: {}]   ;;  %s569_s4 = inlined_call_operand.vmem [shape: f32[32,16], index: 4, kind: input, shape index: {}]   ;;  %s570_s5 = inlined_call_operand.vmem [shape: f32[1,16], index: 5, kind: input, shape index: {}]   ;;  %s571_s6 = inlined_call_operand.vmem [shape: f32[1,16], index: 6, kind: input, shape index: {}]   ;;  %s572_s7 = inlined_call_operand.hbm [shape: f32[8,32], index: 7, kind: output, shape index: {}]  }
   0x1   :  { %13 = vsyncpa [#allocation4], 0  ;;  %s22_s26 = sshll.u32 %s567_s2, 4  ;;  %s432_s27 = smov [#allocation2]   ;;  %s23_s26 = int_to_ptr.hbm [resolvable:$true] %s22_s26 }
   0x2   :  { %s24_s28 = sshll.u32 %s432_s27, 4  ;;  %s433_s29 = smov 128   ;;  %s25_s28 = int_to_ptr.vmem [resolvable:$true] %s24_s28 }
   0x3   :  { %s434_s30 = smov 8  }
   0x4   :  { %30 = dma.hbm_to_vmem [thread:$0]  %s23_s26, 1024, %s25_s28, [#allocation3], %s433_s29, %s433_s29, %s434_s30  }
   0x5   :  { %428 = dma.done.wait [#allocation3], 1024  }
   0x6   :  { %429 = vsyncadd [#allocation3], 4294966272  ;;  %v54_v0 = vld [vmem:[%s568_s3 + $0x18] sm:$0xff]  ;;  %v53_v2 = vld [vmem:[%s568_s3 + $0x10] sm:$0xff]  ;;  %vm55_vm0 = vcmask 261120   ;;  %vm189_vm1 = vcmask 130048  }
   0x7   :  { %v125_v1 = vld [vmem:[%s569_s4 + $0x18] sm:$0xff]  ;;  %92 = vmatpush.msra.mxu0 %v54_v0  ;;  %332 = vmatpush.msra.mxu2 %v54_v0  ;;  %v124_v3 = vld [vmem:[%s569_s4 + $0x10] sm:$0xff]  ;;  %v52_v4 = vld [vmem:[%s568_s3 + $0x8] sm:$0xff]  ;;  %s313_s19 = sshll.u32 %s572_s7, 4  ;;  %s314_s19 = int_to_ptr.hbm [resolvable:$true] %s313_s19 }
   0x8   :  { %333 = vmatpush.msra.mxu3 %v54_v0  ;;  %141 = vmatpush.msra.mxu1 %v125_v1  ;;  %v123_v5 = vld [vmem:[%s569_s4 + $0x8] sm:$0xff]  ;;  %v51_v6 = vld [vmem:[%s568_s3] sm:$0xff]  ;;  %v45_v9 = vld [vmem:[%s565_s0 + $0x10] sm:$0xff] }
   0x9   :  { %93 = vmatpush.msra.mxu0 %v53_v2  ;;  %334 = vmatpush.msra.mxu2 %v53_v2  ;;  %v122_v7 = vld [vmem:[%s569_s4] sm:$0xff]  ;;  %v48_v10 = vld [vmem:[%s565_s0 + $0x28] sm:$0xff]  ;;  %v46_v13 = vld [vmem:[%s565_s0 + $0x18] sm:$0xff] }
   0xa   :  { %335 = vmatpush.msra.mxu3 %v53_v2  ;;  %142 = vmatpush.msra.mxu1 %v124_v3  ;;  %v43_v8 = vld [vmem:[%s565_s0] sm:$0xff]  ;;  %v44_v12 = vld [vmem:[%s565_s0 + $0x8] sm:$0xff]  ;;  %v49_v14 = vld [vmem:[%s565_s0 + $0x30] sm:$0xff] }
   0xb   :  { %94 = vmatpush.msra.mxu0 %v52_v4  ;;  %336 = vmatpush.msra.mxu2 %v52_v4  ;;  %v121_v11 = vld [vmem:[%s566_s1] sm:$0xff]  ;;  %v50_v16 = vld [vmem:[%s565_s0 + $0x38] sm:$0xff] }
   0xc   :  { %337 = vmatpush.msra.mxu3 %v52_v4  ;;  %143 = vmatpush.msra.mxu1 %v123_v5  ;;  %v47_v15 = vld [vmem:[%s565_s0 + $0x20] sm:$0xff] }
   0xd   :  { %95 = vmatpush.msra.mxu0 %v51_v6  ;;  %338 = vmatpush.msra.mxu2 %v51_v6  ;;  %v344_v18 = vld [vmem:[%s570_s5] ss:$0 sm:$0xff]  ;;  %s435_s5 = smov [#allocation5]  }
   0xe   :  { %339 = vmatpush.msra.mxu3 %v51_v6  ;;  %144 = vmatpush.msra.mxu1 %v122_v7  ;;  %v345_v28 = vld [vmem:[%s571_s6] ss:$0 sm:$0xff]  ;;  %s311_s6 = sshll.u32 %s435_s5, 4  ;;  %s312_s6 = int_to_ptr.vmem [resolvable:$true] %s311_s6 }
   0xf   :  { %323 = vmatmul.msk.f32.vlgmr.msra.gmra.mxu0 %vm55_vm0, %v43_v8  ;;  %325 = vmatmul.msk.f32.vlgmr.msra.gmra.mxu2 %vm55_vm0, %v45_v9 }
  0x10   :  { %328 = vmatmul.msk.f32.vlgmr.msra.gmra.mxu3 %vm55_vm0, %v48_v10  ;;  %331 = vmatmul.msk.f32.vlgmr.msra.gmra.mxu1 %vm55_vm0, %v121_v11 }
  0x17   :  { %324 = vmatmul.msk.f32.gmra.mxu0 %vm55_vm0, %v44_v12  ;;  %326 = vmatmul.msk.f32.gmra.mxu2 %vm55_vm0, %v46_v13 }
  0x18   :  { %329 = vmatmul.msk.f32.gmra.mxu3 %vm55_vm0, %v49_v14 }
  0x1f   :  { %327 = vmatmul.msk.f32.gmra.mxu2 %vm55_vm0, %v47_v15 }
  0x20   :  { %330 = vmatmul.msk.f32.gmra.mxu3 %vm55_vm0, %v50_v16 }
  0x8c   :  { %v97_v17 = vpop.f32.mrf.mxu0 }
  0x8d   :  { %v146_v19 = vpop.f32.mrf.mxu1 }
  0x8e   :  { %v149_v20 = vadd.f32 %v146_v19, %v97_v17 }
  0x90   :  { %v161_v21 = vadd.f32 %v344_v18, %v149_v20 }
  0x92   :  { %v103_v22 = vpop.f32.mrf.mxu2  ;;  %346 = vtanh.f32 %v161_v21 }
  0x93   :  { %v151_v23 = vadd.f32 %v146_v19, %v103_v22  ;;  %v112_v24 = vpop.f32.mrf.mxu3 }
  0x94   :  { %v100_v25 = vpop.f32.mrf.mxu0  ;;  %v154_v46 = vadd.f32 %v146_v19, %v112_v24 }
  0x95   :  { %v163_v26 = vadd.f32 %v344_v18, %v151_v23  ;;  %v150_v27 = vadd.f32 %v146_v19, %v100_v25 }
  0x96   :  { %v166_v55 = vadd.f32 %v344_v18, %v154_v46 }
  0x97   :  { %348 = vtanh.f32 %v163_v26  ;;  %v162_v29 = vadd.f32 %v344_v18, %v150_v27 }
  0x98   :  { %v347_v30 = vpop.eup %346 }
  0x99   :  { %350 = vtanh.f32 %v162_v29  ;;  %v181_v31 = vmul.f32 %v347_v30, %v345_v28 }
  0x9a   :  { %v106_v32 = vpop.f32.mrf.mxu2 }
  0x9b   :  { %v152_v33 = vadd.f32 %v146_v19, %v106_v32  ;;  %v115_v34 = vpop.f32.mrf.mxu3  ;;  %v190_v35 = vsel %vm189_vm1, %v181_v31, 0.0 }
  0x9c   :  { %v155_v36 = vadd.f32 %v146_v19, %v115_v34  ;;  %191 = vadd.xlane.f32.xlu0 %v190_v35 }
  0x9d   :  { %v349_v37 = vpop.eup %348  ;;  %v164_v38 = vadd.f32 %v344_v18, %v152_v33 }
  0x9e   :  { %v167_v39 = vadd.f32 %v344_v18, %v155_v36  ;;  %v183_v40 = vmul.f32 %v349_v37, %v345_v28 }
  0x9f   :  { %v351_v41 = vpop.eup %350  ;;  %352 = vtanh.f32 %v164_v38 }
  0xa0   :  { %354 = vtanh.f32 %v167_v39  ;;  %v196_v42 = vsel %vm189_vm1, %v183_v40, 0.0  ;;  %v182_v43 = vmul.f32 %v351_v41, %v345_v28 }
  0xa1   :  { %197 = vadd.xlane.f32.xlu1 %v196_v42 }
  0xa2   :  { %v109_v44 = vpop.f32.mrf.mxu2  ;;  %v193_v45 = vsel %vm189_vm1, %v182_v43, 0.0 }
  0xa3   :  { %v153_v47 = vadd.f32 %v146_v19, %v109_v44  ;;  %v118_v48 = vpop.f32.mrf.mxu3 }
  0xa4   :  { %v156_v49 = vadd.f32 %v146_v19, %v118_v48  ;;  %194 = vadd.xlane.f32.xlu0 %v193_v45 }
  0xa5   :  { %v353_v50 = vpop.eup %352  ;;  %v165_v51 = vadd.f32 %v344_v18, %v153_v47 }
  0xa6   :  { %v355_v52 = vpop.eup %354  ;;  %v168_v53 = vadd.f32 %v344_v18, %v156_v49  ;;  %v184_v54 = vmul.f32 %v353_v50, %v345_v28 }
  0xa7   :  { %356 = vtanh.f32 %v165_v51  ;;  %v187_v56 = vmul.f32 %v355_v52, %v345_v28 }
  0xa8   :  { %358 = vtanh.f32 %v168_v53  ;;  %v199_v57 = vsel %vm189_vm1, %v184_v54, 0.0 }
  0xa9   :  { %200 = vadd.xlane.f32.xlu1 %v199_v57  ;;  %360 = vtanh.f32 %v166_v55  ;;  %v208_v58 = vsel %vm189_vm1, %v187_v56, 0.0 }
  0xac   :  { %209 = vadd.xlane.f32.xlu0 %v208_v58 }
  0xad   :  { %v357_v59 = vpop.eup %356 }
  0xae   :  { %v359_v60 = vpop.eup %358  ;;  %v185_v61 = vmul.f32 %v357_v59, %v345_v28 }
  0xaf   :  { %v188_v62 = vmul.f32 %v359_v60, %v345_v28  ;;  %v361_v0 = vpop.eup %360  ;;  %v274_v60 = vld [vmem:[#allocation2] sm:$0xff] }
  0xb0   :  { %v202_v63 = vsel %vm189_vm1, %v185_v61, 0.0  ;;  %v186_v2 = vmul.f32 %v361_v0, %v345_v28  ;;  %v275_v61 = vld [vmem:[#allocation2 + $0x8] sm:$0xff] }
  0xb1   :  { %v211_v1 = vsel %vm189_vm1, %v188_v62, 0.0  ;;  %203 = vadd.xlane.f32.xlu2 %v202_v63  ;;  %v276_v62 = vld [vmem:[#allocation2 + $0x10] sm:$0xff] }
  0xb2   :  { %212 = vadd.xlane.f32.xlu1 %v211_v1  ;;  %v205_v3 = vsel %vm189_vm1, %v186_v2, 0.0 }
  0xb9   :  { %206 = vadd.xlane.f32.xlu2 %v205_v3  ;;  %v277_v3 = vld [vmem:[#allocation2 + $0x18] sm:$0xff] }
 0x10f   :  { %v192_v5 = vpop.xlane.xlu0 %191 }
 0x114   :  { %v198_v4 = vpop.xlane.xlu1 %197 }
 0x117   :  { %v195_v7 = vpop.xlane.xlu0 %194 }
 0x11c   :  { %v201_v6 = vpop.xlane.xlu1 %200 }
 0x11f   :  { %v210_v10 = vpop.xlane.xlu0 %209 }
 0x120   :  { %v216_v13 = vmax.f32 %v198_v4, %v210_v10 }
 0x124   :  { %v204_v8 = vpop.xlane.xlu2 %203 }
 0x125   :  { %v213_v9 = vpop.xlane.xlu1 %212  ;;  %v214_v14 = vmax.f32 %v192_v5, %v204_v8 }
 0x126   :  { %v217_v11 = vmax.f32 %v201_v6, %v213_v9 }
 0x128   :  { %v219_v16 = vmax.f32 %v216_v13, %v217_v11  ;;  %v279_v13 = vld [vmem:[#allocation2 + $0x28] sm:$0xff] }
 0x12c   :  { %v207_v12 = vpop.xlane.xlu2 %206 }
 0x12d   :  { %v215_v15 = vmax.f32 %v195_v7, %v207_v12 }
 0x12f   :  { %v218_v17 = vmax.f32 %v214_v14, %v215_v15 }
 0x131   :  { %v220_v18 = vmax.f32 %v218_v17, %v219_v16 }
 0x133   :  { %v221_v19 = vsub.f32 %v192_v5, %v220_v18  ;;  %v222_v20 = vsub.f32 %v195_v7, %v220_v18  ;;  %v223_v21 = vsub.f32 %v198_v4, %v220_v18  ;;  %v224_v22 = vsub.f32 %v201_v6, %v220_v18 }
 0x134   :  { %v225_v25 = vsub.f32 %v204_v8, %v220_v18  ;;  %v226_v27 = vsub.f32 %v207_v12, %v220_v18  ;;  %v227_v29 = vsub.f32 %v210_v10, %v220_v18  ;;  %v228_v31 = vsub.f32 %v213_v9, %v220_v18  ;;  %v278_v8 = vld [vmem:[#allocation2 + $0x20] sm:$0xff]  ;;  %v280_v18 = vld [vmem:[#allocation2 + $0x30] sm:$0xff] }
 0x135   :  { %v229_v23 = vmul.f32 1.442695, %v221_v19  ;;  %v231_v24 = vmul.f32 1.442695, %v222_v20  ;;  %v233_v26 = vmul.f32 1.442695, %v223_v21 }
 0x136   :  { %v235_v28 = vmul.f32 1.442695, %v224_v22  ;;  %v237_v30 = vmul.f32 1.442695, %v225_v25  ;;  %v239_v32 = vmul.f32 1.442695, %v226_v27 }
 0x137   :  { %362 = vpow2.f32 %v229_v23  ;;  %v241_v35 = vmul.f32 1.442695, %v227_v29  ;;  %v243_v38 = vmul.f32 1.442695, %v228_v31  ;;  %v281_v23 = vld [vmem:[#allocation2 + $0x38] sm:$0xff] }
 0x138   :  { %364 = vpow2.f32 %v231_v24 }
 0x139   :  { %366 = vpow2.f32 %v233_v26 }
 0x13a   :  { %368 = vpow2.f32 %v235_v28 }
 0x13b   :  { %370 = vpow2.f32 %v237_v30 }
 0x13c   :  { %372 = vpow2.f32 %v239_v32 }
 0x13d   :  { %v363_v33 = vpop.eup %362  ;;  %374 = vpow2.f32 %v241_v35 }
 0x13e   :  { %v365_v34 = vpop.eup %364  ;;  %376 = vpow2.f32 %v243_v38 }
 0x13f   :  { %v245_v36 = vadd.f32 %v365_v34, %v363_v33  ;;  %v367_v37 = vpop.eup %366 }
 0x140   :  { %v369_v40 = vpop.eup %368 }
 0x141   :  { %v246_v39 = vadd.f32 %v367_v37, %v245_v36  ;;  %v371_v42 = vpop.eup %370 }
 0x142   :  { %v373_v44 = vpop.eup %372 }
 0x143   :  { %v247_v41 = vadd.f32 %v369_v40, %v246_v39  ;;  %v375_v46 = vpop.eup %374 }
 0x144   :  { %v377_v48 = vpop.eup %376 }
 0x145   :  { %v248_v43 = vadd.f32 %v371_v42, %v247_v41 }
 0x147   :  { %v249_v45 = vadd.f32 %v373_v44, %v248_v43 }
 0x149   :  { %v250_v47 = vadd.f32 %v375_v46, %v249_v45 }
 0x14b   :  { %v251_v49 = vadd.f32 %v377_v48, %v250_v47 }
 0x14d   :  { %378 = vrcp.f32 %v251_v49  ;;  %v263_v53 = vand.u32 2147483648, %v251_v49  ;;  %v261_v55 = vand.u32 2147483647, %v251_v49  ;;  %vm257_vm3 = vweird.f32 %v251_v49 }
 0x14f   :  { %v264_v57 = vor.u32 1.1754944e-38, %v263_v53  ;;  %vm262_vm5 = vcmp.eq.f32.partialorder %v261_v55, 8.507059e+37 }
 0x153   :  { %v379_v50 = vpop.eup %378 }
 0x154   :  { %v253_v51 = vmul.f32 %v379_v50, %v251_v49  ;;  %vm258_vm2 = vweird.f32 %v379_v50 }
 0x155   :  { %vm259_vm4 = vmor %vm257_vm3, %vm258_vm2 }
 0x156   :  { %v254_v52 = vsub.f32 1.0, %v253_v51 }
 0x158   :  { %v255_v54 = vmul.f32 %v379_v50, %v254_v52 }
 0x15a   :  { %v256_v56 = vadd.f32 %v379_v50, %v255_v54 }
 0x15c   :  { %v260_v58 = vsel %vm259_vm4, %v379_v50, %v256_v56 }
 0x15d   :  { %v265_v59 = vsel %vm262_vm5, %v264_v57, %v260_v58 }
 0x15e   :  { %v266_v63 = vmul.f32 %v363_v33, %v265_v59  ;;  %v267_v0 = vmul.f32 %v365_v34, %v265_v59  ;;  %v268_v1 = vmul.f32 %v367_v37, %v265_v59  ;;  %v269_v2 = vmul.f32 %v369_v40, %v265_v59 }
 0x15f   :  { %v270_v4 = vmul.f32 %v371_v42, %v265_v59  ;;  %v271_v9 = vmul.f32 %v373_v44, %v265_v59  ;;  %v272_v15 = vmul.f32 %v375_v46, %v265_v59  ;;  %v273_v21 = vmul.f32 %v377_v48, %v265_v59 }
 0x160   :  { %v282_v5 = vmul.f32 %v274_v60, %v266_v63  ;;  %v283_v6 = vmul.f32 %v275_v61, %v267_v0  ;;  %v284_v7 = vmul.f32 %v276_v62, %v268_v1  ;;  %v285_v10 = vmul.f32 %v277_v3, %v269_v2 }
 0x161   :  { %v286_v16 = vmul.f32 %v278_v8, %v270_v4  ;;  %v287_v20 = vmul.f32 %v279_v13, %v271_v9  ;;  %v288_v25 = vmul.f32 %v280_v18, %v272_v15  ;;  %v289_v29 = vmul.f32 %v281_v23, %v273_v21 }
 0x162   :  { %v290_v11 = vsel %vm55_vm0, %v282_v5, 0.0  ;;  %v291_v12 = vsel %vm55_vm0, %v283_v6, 0.0  ;;  %v293_v17 = vsel %vm55_vm0, %v284_v7, 0.0  ;;  %v295_v22 = vsel %vm55_vm0, %v285_v10, 0.0 }
 0x163   :  { %v292_v14 = vadd.f32 %v291_v12, %v290_v11  ;;  %v297_v26 = vsel %vm55_vm0, %v286_v16, 0.0  ;;  %v299_v28 = vsel %vm55_vm0, %v287_v20, 0.0  ;;  %v301_v31 = vsel %vm55_vm0, %v288_v25, 0.0 }
 0x164   :  { %v303_v33 = vsel %vm55_vm0, %v289_v29, 0.0 }
 0x165   :  { %v294_v19 = vadd.f32 %v293_v17, %v292_v14 }
 0x167   :  { %v296_v24 = vadd.f32 %v295_v22, %v294_v19 }
 0x169   :  { %v298_v27 = vadd.f32 %v297_v26, %v296_v24 }
 0x16b   :  { %v300_v30 = vadd.f32 %v299_v28, %v298_v27 }
 0x16d   :  { %v302_v32 = vadd.f32 %v301_v31, %v300_v30 }
 0x16f   :  { %v304_v34 = vadd.f32 %v303_v33, %v302_v32 }
 0x171   :  { %305 = vst.msk [vmem:[#allocation5] sm:$0xff] %vm55_vm0, %v304_v34 }
 0x172   :  { %316 = dma.vmem_to_hbm [thread:$0]  %s312_s6, 128, %s314_s19, [#allocation4]  }
 0x173   :  { %430 = dma.done.wait [#allocation4], 128  }
 0x174   :  { %431 = vsyncadd [#allocation4], 4294967168 }
 0x175   :  { %321 = vsyncpa [#allocation3], 1 }
 0x176   :  { %322 = vsyncpa [#allocation4], 1 }

</bundles_post_ra>
